<compile_context>
chip_gen: v7x
topology: tpu7x:2x2x1
jax: 0.10.0
libtpu: 0.0.40
codegen_flags: <defaults>
</compile_context>

<pallas_src>
import functools

import jax
import jax.numpy as jnp
from jax import lax
from jax.experimental import pallas as pl
from jax.experimental.pallas import tpu as pltpu


# ----------------------------------------------------------------------------- config

def _vmem_capacity_bytes():
    try:
        info = pltpu.get_tpu_info()
        cap = getattr(info, "vmem_capacity_bytes", None)
        if cap:
            return int(cap)
    except Exception:
        pass
    return 128 * 1024 * 1024


_VMEM_CAP = _vmem_capacity_bytes()                       # 128 MiB v5e/v6e, 64 MiB v7x
_VMEM_LIMIT = min(int(_VMEM_CAP * 0.70), 100 * 1024 * 1024)
_CONV_VMEM_BUDGET = _VMEM_LIMIT // 2                     # per-step conv working set
_GEMM_TM = 1024                                          # per-review: 512 -> 1024


def _round_up(x, m):
    return ((x + m - 1) // m) * m


def _cparams(sems):
    return pltpu.CompilerParams(dimension_semantics=sems,
                                vmem_limit_bytes=_VMEM_LIMIT)


# ----------------------------------------------------------------------------- GEMM

def _mm_bias_act_kernel(a_ref, b_ref, bias_ref, o_ref, *, act):
    acc = jnp.dot(a_ref[...], b_ref[...], preferred_element_type=jnp.float32)
    acc = acc + bias_ref[...]
    if act == "relu":
        acc = jnp.maximum(acc, 0.0)
    o_ref[...] = acc.astype(o_ref.dtype)


def matmul_bias_act(a, b, bias, act="none", out_dtype=jnp.bfloat16):
    """a: [M, K], b: [K, N], bias: [N] -> act(a @ b + bias).  bf16 MXU, f32 epilogue.

    Ragged last M tile is handled by Pallas masking (no host-side pad pass).
    """
    M, K = a.shape
    _, N = b.shape
    a = a.astype(jnp.bfloat16)
    b = b.astype(jnp.bfloat16)
    tm = min(_GEMM_TM, _round_up(M, 8))
    return pl.pallas_call(
        functools.partial(_mm_bias_act_kernel, act=act),
        out_shape=jax.ShapeDtypeStruct((M, N), out_dtype),
        grid=(pl.cdiv(M, tm),),
        in_specs=[pl.BlockSpec((tm, K), lambda i: (i, 0)),
                  pl.BlockSpec((K, N), lambda i: (0, 0)),
                  pl.BlockSpec((1, N), lambda i: (0, 0))],
        out_specs=pl.BlockSpec((tm, N), lambda i: (i, 0)),
        compiler_params=_cparams(("parallel",)),
        cost_estimate=pl.CostEstimate(
            flops=2 * M * K * N, transcendentals=0,
            bytes_accessed=M * K * 2 + K * N * 2
                           + M * N * jnp.dtype(out_dtype).itemsize),
    )(a, b, bias.reshape(1, N).astype(jnp.float32))


# ----------------------------------------------------------------------------- conv (stride-1, halo-DMA row tiles + in-VMEM im2col)

def _conv_rows_kernel(x_hbm, w_ref, b_ref, o_ref, xbuf, sem,
                      *, KH, KW, Wp, row_tile, act):
    n = pl.program_id(0)
    t = pl.program_id(1)
    rows_in = (row_tile + KH) * Wp
    m_out = row_tile * Wp
    # Halo'd input rows for this output row tile (flattened (rows, Cin) layout).
    # TODO(synk): double-buffer this DMA across consecutive row tiles.
    cp = pltpu.make_async_copy(
        x_hbm.at[n, pl.ds(t * (row_tile * Wp), rows_in)], xbuf, sem)
    cp.start()
    cp.wait()
    # In-VMEM im2col: one lane-concat of the KH*KW sublane-shifted tap views, then a
    # single MXU dot with K = KH*KW*Cin (instead of KH*KW small K=Cin dots).
    cols = [xbuf[pl.ds(i * Wp + j, m_out), :] for i in range(KH) for j in range(KW)]
    patch = jnp.concatenate(cols, axis=-1)                      # (m_out, KH*KW*Cin)
    acc = jnp.dot(patch, w_ref[...], preferred_element_type=jnp.float32)
    acc = acc + b_ref[...]
    if act == "relu":
        acc = jnp.maximum(acc, 0.0)
    o_ref[...] = acc.astype(o_ref.dtype)


def _pick_row_tile(Ho, Wp, Cin, Cout, KH, KW):
    """Largest output-row tile whose working set fits the per-step VMEM budget."""
    per_row = Wp * (KH * KW * Cin * 2      # bf16 im2col patch
                    + Cin * 2              # input rows
                    + Cout * 4             # f32 accumulator
                    + Cout * 2 * 2)        # double-buffered bf16 output block
    fixed = KH * KW * Cin * Cout * 2 * 2 + KH * Wp * Cin * 2
    rt = max(1, (_CONV_VMEM_BUDGET - fixed) // per_row)
    if rt >= Ho:
        return Ho, 1
    rt = max(8, (rt // 8) * 8)             # keep tiled output blocks 8-row aligned
    return rt, pl.cdiv(Ho, rt)


def conv2d_taps(x, w, b, pad, act, out_dtype):
    """stride-1 KxK conv; no host-side im2col (input read ~once, single conv write)."""
    KH, KW, Cin, Cout = w.shape
    N, H, W_, _ = x.shape
    Hp, Wp = H + 2 * pad, W_ + 2 * pad
    Ho, Wo = Hp - KH + 1, Wp - KW + 1
    row_tile, n_tiles = _pick_row_tile(Ho, Wp, Cin, Cout, KH, KW)
    Ho_ceil = row_tile * n_tiles
    pad_bot = Ho_ceil + KH - pad - H       # single pad; guarantees last-tile DMA bounds
    xp = jnp.pad(x.astype(jnp.bfloat16), ((0, 0), (pad, pad_bot), (pad, pad), (0, 0)))
    xf = xp.reshape(N, (Ho_ceil + KH) * Wp, Cin)
    rows_in = (row_tile + KH) * Wp
    wt = w.reshape(KH * KW * Cin, Cout).astype(jnp.bfloat16)
    out = pl.pallas_call(
        functools.partial(_conv_rows_kernel, KH=KH, KW=KW, Wp=Wp,
                          row_tile=row_tile, act=act),
        out_shape=jax.ShapeDtypeStruct((N, Ho * Wp, Cout), out_dtype),
        grid=(N, n_tiles),
        in_specs=[pl.BlockSpec(memory_space=pl.ANY),
                  pl.BlockSpec((KH * KW * Cin, Cout), lambda n, t: (0, 0)),
                  pl.BlockSpec((1, Cout), lambda n, t: (0, 0))],
        out_specs=pl.BlockSpec((None, row_tile * Wp, Cout), lambda n, t: (n, t, 0)),
        scratch_shapes=[pltpu.VMEM((rows_in, Cin), jnp.bfloat16),
                        pltpu.SemaphoreType.DMA(())],
        compiler_params=_cparams(("parallel", "parallel")),
        cost_estimate=pl.CostEstimate(
            flops=2 * N * Ho * Wp * KH * KW * Cin * Cout, transcendentals=0,
            bytes_accessed=N * Hp * Wp * Cin * 2 + KH * KW * Cin * Cout * 2
                           + N * Ho * Wp * Cout * jnp.dtype(out_dtype).itemsize),
    )(xf, wt, b.reshape(1, Cout).astype(jnp.float32))
    # TODO(synk): fold this Wp->Wo crop into the consumer kernel's store.
    return out.reshape(N, Ho, Wp, Cout)[:, :, :Wo, :]


def conv2d_im2col(x, w, b, stride, pad, act, out_dtype):
    """Fallback (stride != 1): bf16 im2col + tiled GEMM."""
    KH, KW, Cin, Cout = w.shape
    N, H, W_, _ = x.shape
    xp = jnp.pad(x.astype(jnp.bfloat16), ((0, 0), (pad, pad), (pad, pad), (0, 0)))
    Ho = (H + 2 * pad - KH) // stride + 1
    Wo = (W_ + 2 * pad - KW) // stride + 1
    patches = []
    for i in range(KH):
        for j in range(KW):
            patches.append(xp[:, i:i + stride * Ho:stride, j:j + stride * Wo:stride, :])
    cols = jnp.concatenate(patches, axis=-1).reshape(N * Ho * Wo, KH * KW * Cin)
    out = matmul_bias_act(cols, w.reshape(KH * KW * Cin, Cout), b, act=act,
                          out_dtype=out_dtype)
    return out.reshape(N, Ho, Wo, Cout)


def conv2d(x, w, b, stride=1, pad=0, act="none", out_dtype=jnp.bfloat16):
    """Same semantics as nn.Conv2d (NHWC / [KH,KW,Cin,Cout])."""
    KH, KW, Cin, Cout = w.shape
    if KH == 1 and KW == 1 and pad == 0:
        xs = x if stride == 1 else x[:, ::stride, ::stride, :]
        N, Ho, Wo, _ = xs.shape
        out = matmul_bias_act(xs.reshape(N * Ho * Wo, Cin), w.reshape(Cin, Cout), b,
                              act=act, out_dtype=out_dtype)
        return out.reshape(N, Ho, Wo, Cout)
    if stride == 1:
        return conv2d_taps(x, w, b, pad, act, out_dtype)
    return conv2d_im2col(x, w, b, stride, pad, act, out_dtype)


# ----------------------------------------------------------------------------- GroupNorm (+ fused residual add/ReLU)

def _gn_scale_shift(x32, a_mat, s_mat, gamma, beta, inv_cnt, eps):
    csum = jnp.sum(x32, axis=0, keepdims=True)                 # (1, C)
    csq = jnp.sum(x32 * x32, axis=0, keepdims=True)
    gsum = jnp.dot(csum, a_mat, preferred_element_type=jnp.float32)   # (1, G)
    gsq = jnp.dot(csq, a_mat, preferred_element_type=jnp.float32)
    mean_g = gsum * inv_cnt
    var_g = jnp.maximum(gsq * inv_cnt - mean_g * mean_g, 0.0)
    rstd_g = lax.rsqrt(var_g + eps)
    mean_c = jnp.dot(mean_g, s_mat, preferred_element_type=jnp.float32)  # (1, C)
    rstd_c = jnp.dot(rstd_g, s_mat, preferred_element_type=jnp.float32)
    scale_c = rstd_c * gamma
    shift_c = beta - mean_c * scale_c
    return scale_c.astype(jnp.bfloat16), shift_c.astype(jnp.bfloat16)


def _gn_kernel(x_ref, a_ref, s_ref, g_ref, b_ref, o_ref, *, inv_cnt, eps, relu):
    xb = x_ref[...]                                            # (HW, C) bf16
    scale_c, shift_c = _gn_scale_shift(xb.astype(jnp.float32), a_ref[...], s_ref[...],
                                       g_ref[...], b_ref[...], inv_cnt, eps)
    y = xb * scale_c + shift_c                                 # bf16 VPU elementwise
    if relu:
        y = jnp.maximum(y, 0.0)
    o_ref[...] = y.astype(o_ref.dtype)


def _gn_add_relu_kernel(x_ref, skip_ref, a_ref, s_ref, g_ref, b_ref, o_ref,
                        *, inv_cnt, eps):
    xb = x_ref[...]
    scale_c, shift_c = _gn_scale_shift(xb.astype(jnp.float32), a_ref[...], s_ref[...],
                                       g_ref[...], b_ref[...], inv_cnt, eps)
    y = jnp.maximum(xb * scale_c + shift_c, 0.0)               # ReLU(norm2(conv2(.)))
    y = jnp.maximum(skip_ref[...] + y, 0.0)                    # ReLU(skip + y)
    o_ref[...] = y.astype(o_ref.dtype)


def group_norm(x, gamma, beta, num_groups, relu=True, residual=None, eps=1e-5,
               out_dtype=jnp.bfloat16):
    """Matches nn.GroupNorm(num_groups, C)(NCHW x) [+ ReLU] [+ ReLU(residual + .)].

    TODO(synk): two-pass tiled reduction over HW for production resolutions (current
    whole-image (HW, C) block per batch element bounds VMEM only at small HW).
    """
    N, H, W, C = x.shape
    G = num_groups
    Cg = C // G
    HW = H * W
    xr = x.reshape(N, HW, C).astype(jnp.bfloat16)
    grp = jnp.arange(C, dtype=jnp.int32) // Cg
    a_mat = (grp[:, None] == jnp.arange(G, dtype=jnp.int32)[None, :]).astype(jnp.float32)
    s_mat = a_mat.T
    g2 = gamma.reshape(1, C).astype(jnp.float32)
    b2 = beta.reshape(1, C).astype(jnp.float32)
    inv_cnt = 1.0 / float(HW * Cg)

    x_spec = pl.BlockSpec((None, HW, C), lambda n: (n, 0, 0))

    def small(shape):
        return pl.BlockSpec(shape, lambda n: tuple(0 for _ in shape))

    if residual is None:
        kern = functools.partial(_gn_kernel, inv_cnt=inv_cnt, eps=eps, relu=relu)
        in_specs = [x_spec, small((C, G)), small((G, C)), small((1, C)), small((1, C))]
        args = (xr, a_mat, s_mat, g2, b2)
        n_big = 2
    else:
        kern = functools.partial(_gn_add_relu_kernel, inv_cnt=inv_cnt, eps=eps)
        r = residual.reshape(N, HW, C).astype(jnp.bfloat16)
        in_specs = [x_spec, x_spec, small((C, G)), small((G, C)),
                    small((1, C)), small((1, C))]
        args = (xr, r, a_mat, s_mat, g2, b2)
        n_big = 3

    out = pl.pallas_call(
        kern,
        out_shape=jax.ShapeDtypeStruct((N, HW, C), out_dtype),
        grid=(N,),
        in_specs=in_specs,
        out_specs=pl.BlockSpec((None, HW, C), lambda n: (n, 0, 0)),
        compiler_params=_cparams(("parallel",)),
        cost_estimate=pl.CostEstimate(
            flops=10 * N * HW * C, transcendentals=N * C,
            bytes_accessed=n_big * N * HW * C * 2
                           + N * HW * C * jnp.dtype(out_dtype).itemsize),
    )(*args)
    return out.reshape(N, H, W, C)


# ----------------------------------------------------------------------------- fused parameter heads

_HEADS = ("rot_head", "scale_head", "opacity_head", "depth_head")
_HEAD_COUT = (4, 3, 1, 1)
_HEAD_NPAD = 128   # lane-dense single output block (columns 9..127 are zero-weight pads)


def _head_kernel(a_ref, w_ref, b_ref, o_ref):
    y = jnp.dot(a_ref[...], w_ref[...], preferred_element_type=jnp.float32)
    y = y + b_ref[...]                                           # (tm, 128) f32
    lane = lax.broadcasted_iota(jnp.int32, y.shape, 1)
    # quaternion L2-normalize over lanes [0,4): rsqrt instead of sqrt+divide.
    rot_sq = jnp.sum(jnp.where(lane < 4, y * y, 0.0), axis=-1, keepdims=True)
    rot_v = y * lax.rsqrt(jnp.maximum(rot_sq, 1e-24))            # 1/max(||q||,1e-12)
    scale_v = jnp.minimum(jax.nn.softplus(y), 0.002)             # Softplus + clamp_max
    opa_v = jax.nn.sigmoid(y)
    dep_v = jnp.tanh(y) * 0.5
    o_ref[...] = jnp.where(lane < 4, rot_v,
                 jnp.where(lane < 7, scale_v,
                 jnp.where(lane < 8, opa_v, dep_v)))


def fused_heads(x, params):
    """Four heads fused: one 3x3 conv (Cout=4*head_dim) + one lane-dense 1x1 GEMM."""
    hd = params["rot_head"]["w1"].shape[-1]
    w1 = jnp.concatenate([params[h]["w1"] for h in _HEADS], axis=-1)    # (3,3,hd,4hd)
    b1 = jnp.concatenate([params[h]["b1"] for h in _HEADS], axis=0)
    hid = conv2d(x, w1, b1, stride=1, pad=1, act="relu")                # (N,H,W,4hd)

    N, H, W, K = hid.shape
    # block-diagonal second-layer weight, zero-padded to 128 output lanes
    w2 = jnp.zeros((K, _HEAD_NPAD), jnp.float32)
    b2 = jnp.zeros((1, _HEAD_NPAD), jnp.float32)
    off = 0
    for idx, (h, co) in enumerate(zip(_HEADS, _HEAD_COUT)):
        w2 = w2.at[idx * hd:(idx + 1) * hd, off:off + co].set(
            params[h]["w2"].reshape(hd, co))
        b2 = b2.at[0, off:off + co].set(params[h]["b2"])
        off += co

    M = N * H * W
    a = hid.reshape(M, K)
    tm = min(_GEMM_TM, _round_up(M, 8))
    out = pl.pallas_call(
        _head_kernel,
        out_shape=jax.ShapeDtypeStruct((M, _HEAD_NPAD), jnp.float32),
        grid=(pl.cdiv(M, tm),),
        in_specs=[pl.BlockSpec((tm, K), lambda i: (i, 0)),
                  pl.BlockSpec((K, _HEAD_NPAD), lambda i: (0, 0)),
                  pl.BlockSpec((1, _HEAD_NPAD), lambda i: (0, 0))],
        out_specs=pl.BlockSpec((tm, _HEAD_NPAD), lambda i: (i, 0)),
        compiler_params=_cparams(("parallel",)),
        cost_estimate=pl.CostEstimate(
            flops=2 * M * K * _HEAD_NPAD, transcendentals=4 * M * _HEAD_NPAD,
            bytes_accessed=M * K * 2 + K * _HEAD_NPAD * 2 + M * _HEAD_NPAD * 4),
    )(a, w2.astype(jnp.bfloat16), b2)

    rot = out[:, 0:4].reshape(N, H, W, 4)
    scale = out[:, 4:7].reshape(N, H, W, 3)
    opacity = out[:, 7:8].reshape(N, H, W, 1)
    dep = out[:, 8:9].reshape(N, H, W, 1)
    return rot, scale, opacity, dep


# ----------------------------------------------------------------------------- glue ops

def upsample2x_bilinear(x):
    """nn.Upsample(scale_factor=2, mode='bilinear', align_corners=False), gather-free.

    TODO(synk): move into a Pallas kernel / fold into the next conv's patch build to
    save the extra HBM passes of the concat/stack/reshape glue.
    """
    def interp(v, axis):
        size = v.shape[axis]
        first = lax.slice_in_dim(v, 0, 1, axis=axis)
        last = lax.slice_in_dim(v, size - 1, size, axis=axis)
        prev = jnp.concatenate([first, lax.slice_in_dim(v, 0, size - 1, axis=axis)],
                               axis=axis)
        nxt = jnp.concatenate([lax.slice_in_dim(v, 1, size, axis=axis), last], axis=axis)
        even = 0.25 * prev + 0.75 * v
        odd = 0.75 * v + 0.25 * nxt
        out = jnp.stack([even, odd], axis=axis + 1)
        new_shape = list(v.shape)
        new_shape[axis] = 2 * size
        return out.reshape(new_shape)
    return interp(interp(x, 1), 2)


# ----------------------------------------------------------------------------- modules

def residual_block(x, p):
    # RAFT-style block: y = ReLU(norm2(conv2(ReLU(norm1(conv1 x))))); out = ReLU(skip+y)
    y = conv2d(x, p["w1"], p["b1"], stride=p["stride"], pad=1)
    y = group_norm(y, p["g1"], p["bt1"], p["ng"], relu=True)
    y = conv2d(y, p["w2"], p["b2"], stride=1, pad=1)
    if p["has_ds"]:
        skip = conv2d(x, p["wd"], p["bd"], stride=p["stride"], pad=0)
        skip = group_norm(skip, p["g3"], p["bt3"], p["ng"], relu=False)
    else:
        skip = x.astype(jnp.bfloat16)
    return group_norm(y, p["g2"], p["bt2"], p["ng"], relu=True, residual=skip)


def unet_extractor(x, p):
    x = conv2d(x, p["in_w"], p["in_b"], stride=2, pad=2)
    x = group_norm(x, p["in_g"], p["in_bt"], 8, relu=True)
    x1 = residual_block(residual_block(x, p["res1"][0]), p["res1"][1])
    x2 = residual_block(residual_block(x1, p["res2"][0]), p["res2"][1])
    x3 = residual_block(residual_block(x2, p["res3"][0]), p["res3"][1])
    return x1, x2, x3


def gs_regresser_forward(img, depth, img_feat, params):
    """img: [N,H,W,3], depth: [N,H,W,1], img_feat: (f1@H/2, f2@H/4, f3@H/8) NHWC."""
    img_feat1, img_feat2, img_feat3 = [f.astype(jnp.bfloat16) for f in img_feat]
    depth_feat1, depth_feat2, depth_feat3 = unet_extractor(depth, params["depth_encoder"])

    feat3 = jnp.concatenate([img_feat3, depth_feat3], axis=-1)
    feat2 = jnp.concatenate([img_feat2, depth_feat2], axis=-1)
    feat1 = jnp.concatenate([img_feat1, depth_feat1], axis=-1)

    up3 = residual_block(residual_block(feat3, params["dec3"][0]), params["dec3"][1])
    up3 = upsample2x_bilinear(up3)
    up2 = residual_block(residual_block(jnp.concatenate([up3, feat2], axis=-1),
                                        params["dec2"][0]), params["dec2"][1])
    up2 = upsample2x_bilinear(up2)
    up1 = residual_block(residual_block(jnp.concatenate([up2, feat1], axis=-1),
                                        params["dec1"][0]), params["dec1"][1])
    up1 = upsample2x_bilinear(up1)

    out = jnp.concatenate([up1, img.astype(jnp.bfloat16), depth.astype(jnp.bfloat16)],
                          axis=-1)
    out = conv2d(out, params["out_w"], params["out_b"], stride=1, pad=1, act="relu")

    rot_out, scale_out, opacity_out, dep_out = fused_heads(out, params)
    return rot_out, scale_out, opacity_out, dep_out


# ----------------------------------------------------------------------------- params

def _conv_params(key, kh, kw, cin, cout):
    k1, k2 = jax.random.split(key)
    w = jax.random.normal(k1, (kh, kw, cin, cout), jnp.float32) / jnp.sqrt(kh * kw * cin)
    b = 0.01 * jax.random.normal(k2, (cout,), jnp.float32)
    return w, b


def _gn_params(key, c):
    k1, k2 = jax.random.split(key)
    return 1.0 + 0.1 * jax.random.normal(k1, (c,), jnp.float32), \
           0.1 * jax.random.normal(k2, (c,), jnp.float32)


def _rb_params(key, cin, cout, stride=1):
    ks = jax.random.split(key, 6)
    p = {"stride": stride, "ng": cout // 8, "has_ds": (stride != 1 or cin != cout)}
    p["w1"], p["b1"] = _conv_params(ks[0], 3, 3, cin, cout)
    p["g1"], p["bt1"] = _gn_params(ks[1], cout)
    p["w2"], p["b2"] = _conv_params(ks[2], 3, 3, cout, cout)
    p["g2"], p["bt2"] = _gn_params(ks[3], cout)
    if p["has_ds"]:
        p["wd"], p["bd"] = _conv_params(ks[4], 1, 1, cin, cout)
        p["g3"], p["bt3"] = _gn_params(ks[5], cout)
    return p


def init_params(key, rgb_dims, depth_dims, dec_dims, head_dim, rgb_dim=3, depth_dim=1):
    keys = iter(jax.random.split(key, 32))
    P = {}
    enc = {}
    enc["in_w"], enc["in_b"] = _conv_params(next(keys), 5, 5, depth_dim, 32)
    enc["in_g"], enc["in_bt"] = _gn_params(next(keys), 32)
    enc["res1"] = [_rb_params(next(keys), 32, depth_dims[0], 1),
                   _rb_params(next(keys), depth_dims[0], depth_dims[0], 1)]
    enc["res2"] = [_rb_params(next(keys), depth_dims[0], depth_dims[1], 2),
                   _rb_params(next(keys), depth_dims[1], depth_dims[1], 1)]
    enc["res3"] = [_rb_params(next(keys), depth_dims[1], depth_dims[2], 2),
                   _rb_params(next(keys), depth_dims[2], depth_dims[2], 1)]
    P["depth_encoder"] = enc
    P["dec3"] = [_rb_params(next(keys), rgb_dims[2] + depth_dims[2], dec_dims[2], 1),
                 _rb_params(next(keys), dec_dims[2], dec_dims[2], 1)]
    P["dec2"] = [_rb_params(next(keys), rgb_dims[1] + depth_dims[1] + dec_dims[2], dec_dims[1], 1),
                 _rb_params(next(keys), dec_dims[1], dec_dims[1], 1)]
    P["dec1"] = [_rb_params(next(keys), rgb_dims[0] + depth_dims[0] + dec_dims[1], dec_dims[0], 1),
                 _rb_params(next(keys), dec_dims[0], dec_dims[0], 1)]
    P["out_w"], P["out_b"] = _conv_params(next(keys), 3, 3, 48 + rgb_dim + 1, 32)

    def head_params(k, cout):
        k1, k2 = jax.random.split(k)
        w1, b1 = _conv_params(k1, 3, 3, head_dim, head_dim)
        w2, b2 = _conv_params(k2, 1, 1, head_dim, cout)
        return {"w1": w1, "b1": b1, "w2": w2, "b2": b2}

    P["rot_head"] = head_params(next(keys), 4)
    P["scale_head"] = head_params(next(keys), 3)
    P["opacity_head"] = head_params(next(keys), 1)
    P["depth_head"] = head_params(next(keys), 1)
    return P


# ----------------------------------------------------------------------------- main

if __name__ == "__main__":
    # Small synthetic config (decoder_dims[0]=48 and head_dim=32 are required by the
    # hard-coded 48+rgb_dim+1 -> 32 out_conv in the PyTorch module).
    RGB_DIMS = [16, 24, 32]      # cfg.raft.encoder_dims
    DEPTH_DIMS = [16, 24, 32]    # cfg.gsnet.encoder_dims
    DEC_DIMS = [48, 32, 32]      # cfg.gsnet.decoder_dims
    HEAD_DIM = 32                # cfg.gsnet.parm_head_dim

    B, H, W = 2, 16, 16
    key = jax.random.PRNGKey(0)
    k_img, k_dep, k_f1, k_f2, k_f3, k_par = jax.random.split(key, 6)

    img = jax.random.normal(k_img, (B, H, W, 3), jnp.float32)
    depth = jax.random.normal(k_dep, (B, H, W, 1), jnp.float32)
    img_feat1 = jax.random.normal(k_f1, (B, H // 2, W // 2, RGB_DIMS[0]), jnp.float32)
    img_feat2 = jax.random.normal(k_f2, (B, H // 4, W // 4, RGB_DIMS[1]), jnp.float32)
    img_feat3 = jax.random.normal(k_f3, (B, H // 8, W // 8, RGB_DIMS[2]), jnp.float32)

    params = init_params(k_par, RGB_DIMS, DEPTH_DIMS, DEC_DIMS, HEAD_DIM)

    rot, scale, opacity, dep = gs_regresser_forward(
        img, depth, (img_feat1, img_feat2, img_feat3), params)
    jax.block_until_ready((rot, scale, opacity, dep))

    assert rot.shape == (B, H, W, 4)
    assert scale.shape == (B, H, W, 3)
    assert opacity.shape == (B, H, W, 1)
    assert dep.shape == (B, H, W, 1)
    print("KERNEL_OK")
</pallas_src>

<mosaic_0001>
module attributes {stable_mosaic.version = 11 : i64} {
  func.func @_mm_bias_act_kernel(%arg0: i32, %arg1: memref<128x25xbf16, #tpu.memory_space<vmem>>, %arg2: memref<25x32xbf16, #tpu.memory_space<vmem>>, %arg3: memref<1x32xf32, #tpu.memory_space<vmem>>, %arg4: memref<128x32xbf16, #tpu.memory_space<vmem>>) attributes {dimension_semantics = [#tpu.dimension_semantics<parallel>], iteration_bounds = array<i64: 1>, scalar_prefetch = 0 : i64, scratch_operands = 0 : i64, tpu.core_type = #tpu.core_type<tc>, window_params = [{transform_indices = @transform_0, window_bounds = array<i64: 128, 25>}, {pipeline_mode = #tpu.pipeline_mode<synchronous>, transform_indices = @transform_1, window_bounds = array<i64: 25, 32>}, {pipeline_mode = #tpu.pipeline_mode<synchronous>, transform_indices = @transform_2, window_bounds = array<i64: 1, 32>}, {transform_indices = @transform_3, window_bounds = array<i64: 128, 32>}]} {
    %c0 = arith.constant 0 : index
    %c0_0 = arith.constant 0 : index
    %0 = vector.load %arg1[%c0, %c0_0] : memref<128x25xbf16, #tpu.memory_space<vmem>>, vector<128x25xbf16>
    %c0_1 = arith.constant 0 : index
    %c0_2 = arith.constant 0 : index
    %1 = vector.load %arg2[%c0_1, %c0_2] : memref<25x32xbf16, #tpu.memory_space<vmem>>, vector<25x32xbf16>
    %cst = arith.constant dense<0.000000e+00> : vector<128x32xf32>
    %2 = tpu.matmul %0, %1, %cst {dimension_numbers = #tpu.dot_dimension_numbers<[1], [0], [0], [1], [0, 0, 1, 1], [], []>} : vector<128x25xbf16>, vector<25x32xbf16>, vector<128x32xf32> -> vector<128x32xf32>
    %c0_3 = arith.constant 0 : index
    %c0_4 = arith.constant 0 : index
    %3 = vector.load %arg3[%c0_3, %c0_4] : memref<1x32xf32, #tpu.memory_space<vmem>>, vector<1x32xf32>
    %4 = vector.broadcast %3 : vector<1x32xf32> to vector<128x32xf32>
    %5 = arith.addf %2, %4 : vector<128x32xf32>
    %6 = arith.truncf %5 : vector<128x32xf32> to vector<128x32xbf16>
    %c0_5 = arith.constant 0 : index
    %c0_6 = arith.constant 0 : index
    %7 = vector.load %arg4[%c0_5, %c0_6] : memref<128x32xbf16, #tpu.memory_space<vmem>>, vector<128x32xbf16>
    tpu.vector_store %arg4[%c0_5, %c0_6], %6 {strides = array<i32>} : memref<128x32xbf16, #tpu.memory_space<vmem>>, vector<128x32xbf16>,
    return
  }
  func.func @transform_0(%arg0: i32) -> (i32, i32) {
    %c0_i32 = arith.constant 0 : i32
    %c0_i32_0 = arith.constant 0 : i32
    return %arg0, %c0_i32 : i32, i32
  }
  func.func @transform_1(%arg0: i32) -> (i32, i32) {
    %c0_i32 = arith.constant 0 : i32
    %c0_i32_0 = arith.constant 0 : i32
    %c0_i32_1 = arith.constant 0 : i32
    return %c0_i32, %c0_i32_0 : i32, i32
  }
  func.func @transform_2(%arg0: i32) -> (i32, i32) {
    %c0_i32 = arith.constant 0 : i32
    %c0_i32_0 = arith.constant 0 : i32
    %c0_i32_1 = arith.constant 0 : i32
    return %c0_i32, %c0_i32_0 : i32, i32
  }
  func.func @transform_3(%arg0: i32) -> (i32, i32) {
    %c0_i32 = arith.constant 0 : i32
    %c0_i32_0 = arith.constant 0 : i32
    return %arg0, %c0_i32 : i32, i32
  }
}

</mosaic_0001>

<bundles_post_ra>
// kernel: tpu_custom_call.1
= control target key start
LH: loop header
LB: loop body
LE: loop exit
PB: predicated region body
PF: predicated region fallthrough
CT: control target
= control target key end

     0   :  { %8 = vsyncpa [#allocation3], 0  ;;  %s672_s0 = inlined_call_operand.hbm [shape: bf16[128,25], index: 0, kind: input, shape index: {}]   ;;  %s673_s1 = inlined_call_operand.hbm [shape: bf16[25,32], index: 1, kind: input, shape index: {}]   ;;  %s674_s2 = inlined_call_operand.hbm [shape: f32[1,32], index: 2, kind: input, shape index: {}]   ;;  %s675_s3 = inlined_call_operand.hbm [shape: bf16[128,32], index: 3, kind: output, shape index: {}]  }
   0x1   :  { %9 = vsyncpa [#allocation6], 0 }
   0x2   :  { %10 = vsyncpa [#allocation4], 0  ;;  %s557_s12 = smov [#allocation5]   ;;  %s558_s14 = smov [#allocation2]  }
   0x3   :  { %s28_s13 = sshll.u32 %s557_s12, 4  ;;  %s16_s15 = sshll.u32 %s558_s14, 4  ;;  %s29_s13 = int_to_ptr.vmem [resolvable:$true] %s28_s13  ;;  %s584_s15 = int_to_ptr.vmem [resolvable:$true] %s16_s15 }
   0x4   :  { %s463_s18 = scalar_lea.hbm %s673_s1, 256 }
   0x5   :  { %p464_p0 = scmp.ne.s32.totalorder %s673_s1, %s463_s18  ;;  %p467_p1 = scmp.lt.u32.totalorder %s463_s18, %s673_s1 }
   0x7   :  { %p469_p2 = pnand %p467_p1, %p464_p0 }
   0x9   :  { %472 = shalt.err (!%p469_p2)
}
   0xa   :  { %s473_s23 = scalar_lea.vmem %s29_s13, 256  ;;  %p478_p4 = scmp.lt.s32.totalorder %s29_s13, %s29_s13 }
   0xb   :  { %p474_p3 = scmp.ne.s32.totalorder %s29_s13, %s473_s23  ;;  %p479_p5 = scmp.lt.s32.totalorder %s473_s23, %s473_s23 }
   0xd   :  { %p480_p6 = por %p479_p5, %p478_p4 }
   0xf   :  { %p481_p7 = pnand %p480_p6, %p474_p3 }
  0x11   :  { %484 = shalt.err (!%p481_p7)
}
  0x12   :  { %s559_s24 = smov 64   ;;  %s560_s25 = smov 4  }
  0x13   :  { %34 = dma.hbm_to_vmem [thread:$0]  %s673_s1, 256, %s29_s13, [#allocation6], %s559_s24, %s559_s24, %s560_s25  }
  0x14   :  { %s485_s30 = scalar_lea.hbm %s672_s0, 1024 }
  0x15   :  { %p486_p8 = scmp.ne.s32.totalorder %s672_s0, %s485_s30  ;;  %p489_p9 = scmp.lt.u32.totalorder %s485_s30, %s672_s0 }
  0x17   :  { %p491_p10 = pnand %p489_p9, %p486_p8 }
  0x19   :  { %494 = shalt.err (!%p491_p10)
}
  0x1a   :  { %s495_s8 = scalar_lea.vmem %s584_s15, 1024  ;;  %p500_p12 = scmp.lt.s32.totalorder %s584_s15, %s584_s15 }
  0x1b   :  { %p496_p11 = scmp.ne.s32.totalorder %s584_s15, %s495_s8  ;;  %p501_p13 = scmp.lt.s32.totalorder %s495_s8, %s495_s8 }
  0x1d   :  { %p502_p0 = por %p501_p13, %p500_p12 }
  0x1f   :  { %p503_p1 = pnand %p502_p0, %p496_p11 }
  0x21   :  { %506 = shalt.err (!%p503_p1)
}
  0x22   :  { %22 = dma.hbm_to_vmem [thread:$0]  %s672_s0, 1024, %s584_s15, [#allocation3], %s559_s24, %s559_s24, %s560_s25  }
  0x23   :  { %s561_s10 = smov [#allocation7]   ;;  %s507_s14 = scalar_lea.hbm %s674_s2, 16 }
  0x24   :  { %s41_s11 = sshll.u32 %s561_s10, 4  ;;  %p508_p2 = scmp.ne.s32.totalorder %s674_s2, %s507_s14  ;;  %s42_s11 = int_to_ptr.vmem [resolvable:$true] %s41_s11 }
  0x25   :  { %p511_p3 = scmp.lt.u32.totalorder %s507_s14, %s674_s2 }
  0x27   :  { %p513_p4 = pnand %p511_p3, %p508_p2 }
  0x29   :  { %516 = shalt.err (!%p513_p4)
}
  0x2a   :  { %s517_s20 = scalar_lea.vmem %s42_s11, 16  ;;  %s521_s0 = scalar_lea.vmem %s42_s11, 32 }
  0x2b   :  { %p518_p5 = scmp.ne.s32.totalorder %s42_s11, %s517_s20  ;;  %p522_p6 = scmp.lt.s32.totalorder %s42_s11, %s42_s11 }
  0x2c   :  { %p523_p7 = scmp.lt.s32.totalorder %s521_s0, %s517_s20 }
  0x2e   :  { %p524_p8 = por %p523_p7, %p522_p6 }
  0x30   :  { %p525_p9 = pnand %p524_p8, %p518_p5 }
  0x32   :  { %528 = shalt.err (!%p525_p9)
}
  0x33   :  { %44 = dma.hbm_to_vmem [thread:$0]  %s674_s2, 16, %s42_s11, [#allocation6]  }
  0x34   :  { %551 = dma.done.wait [#allocation3], 1024  }
  0x35   :  { %552 = vsyncadd [#allocation3], 4294966272 }
  0x36   :  { %553 = dma.done.wait [#allocation6], 272  }
  0x37   :  { %554 = vsyncadd [#allocation6], 4294967024  ;;  %vm158_vm0 = vcmask 1043456   ;;  %vm159_vm1 = vcmask 1044480   ;;  %v562_v0 = vmov 65535   ;;  %vm133_vm2 = vcmask 203776  }
  0x38   :  { %v160_v1 = vsel %vm158_vm0, 4294967295, %v562_v0  ;;  %v453_v2 = vld [vmem:[#allocation5] sm:$0xff]   ;;  %v454_v4 = vld [vmem:[#allocation5 + $0x8] sm:$0x1f]   ;;  %v459_v10 = vld [vmem:[#allocation2 + $0x10] sm:$0xff]   ;;  %vm326_vm3 = vcmask 257024  }
  0x39   :  { %v161_v3 = vsel %vm159_vm1, %v160_v1, 0  ;;  %422 = vmatprep.subr.bf16.mxu0 %v453_v2  ;;  %442 = vmatprep.subr.bf16.mxu1 %v453_v2  ;;  %v455_v5 = vld [vmem:[#allocation2] sm:$0xff]   ;;  %v457_v8 = vld [vmem:[#allocation2 + $0x8] sm:$0xff]   ;;  %v460_v11 = vld [vmem:[#allocation2 + $0x30] sm:$0xff]   ;;  %s563_s2 = smov [#allocation8]  }
  0x3a   :  { %423 = vmatpush3.bf16.msra.mxu0 %v453_v2  ;;  %444 = vmatpush3.bf16.msra.mxu1 %v453_v2  ;;  %v163_v6 = vand.u32 %v454_v4, %v161_v3  ;;  %v456_v7 = vld [vmem:[#allocation2 + $0x20] sm:$0xff]   ;;  %v458_v9 = vld [vmem:[#allocation2 + $0x28] sm:$0xff]   ;;  %v461_v12 = vld [vmem:[#allocation2 + $0x18] sm:$0xff]   ;;  %s348_s22 = sshll.u32 %s563_s2, 4  ;;  %s349_s22 = int_to_ptr.vmem [resolvable:$true] %s348_s22 }
  0x3b   :  { %426 = vmatprep.mubr.msk.bf16.mxu0 %vm133_vm2, %v455_v5  ;;  %434 = vmatprep.mubr.msk.bf16.mxu1 %vm133_vm2, %v456_v7  ;;  %v462_v13 = vld [vmem:[#allocation2 + $0x38] sm:$0xff]   ;;  %v361_v14 = vld [vmem:[#allocation7] ss:$0 sm:$0xff]  ;;  %s529_s23 = scalar_lea.vmem %s349_s22, 1024  ;;  %p534_p11 = scmp.lt.s32.totalorder %s349_s22, %s349_s22 }
  0x3c   :  { %424 = vmatprep.subr.bf16.mxu0 %v163_v6  ;;  %443 = vmatprep.subr.bf16.mxu1 %v163_v6  ;;  %p530_p10 = scmp.ne.s32.totalorder %s349_s22, %s529_s23  ;;  %p535_p12 = scmp.lt.s32.totalorder %s529_s23, %s529_s23 }
  0x3e   :  { %425 = vmatpush3.bf16.msra.mxu0 %v163_v6  ;;  %445 = vmatpush3.bf16.msra.mxu1 %v163_v6  ;;  %p536_p13 = por %p535_p12, %p534_p11 }
  0x40   :  { %p537_p0 = pnand %p536_p13, %p530_p10 }
  0x41   :  { %427 = vmatmul.mubr.msk.bf16.vlgmr.msra.gmra.mrb[0].mxu0 %vm133_vm2, %v457_v8  ;;  %435 = vmatmul.mubr.msk.bf16.vlgmr.msra.gmra.mrb[0].mxu1 %vm133_vm2, %v458_v9 }
  0x42   :  { %430 = vmatprep.mubr.msk.bf16.mxu0 %vm133_vm2, %v459_v10  ;;  %438 = vmatprep.mubr.msk.bf16.mxu1 %vm133_vm2, %v460_v11 }
  0x49   :  { %431 = vmatmul.mubr.msk.bf16.gmra.mrb[4].mxu0 %vm133_vm2, %v461_v12  ;;  %439 = vmatmul.mubr.msk.bf16.gmra.mrb[4].mxu1 %vm133_vm2, %v462_v13 }
 0x114   :  { %v428_v15 = vpop.f32.mrb[0].mxu0  ;;  %v436_v16 = vpop.f32.mrb[0].mxu1 }
 0x115   :  { %v208_v17 = vadd.f32 %v428_v15, %v361_v14  ;;  %v240_v18 = vadd.f32 %v436_v16, %v361_v14  ;;  %v199_v19 = vpop.f32.mrb[1].mxu0  ;;  %v231_v20 = vpop.f32.mrb[1].mxu1 }
 0x116   :  { %v200_v21 = vadd.f32 %v361_v14, %v199_v19  ;;  %v232_v22 = vadd.f32 %v361_v14, %v231_v20  ;;  %v429_v23 = vpop.f32.mrb[2].mxu0  ;;  %v437_v24 = vpop.f32.mrb[2].mxu1 }
 0x117   :  { %v398_v25 = vpack.c.bf16 %v208_v17, %v208_v17  ;;  %v406_v26 = vpack.c.bf16 %v240_v18, %v240_v18  ;;  %v211_v27 = vadd.f32 %v429_v23, %v361_v14  ;;  %v243_v28 = vadd.f32 %v437_v24, %v361_v14  ;;  %v202_v29 = vpop.f32.mrb[3].mxu0  ;;  %v234_v30 = vpop.f32.mrb[3].mxu1 }
 0x118   :  { %v396_v31 = vpack.c.bf16 %v200_v21, %v200_v21  ;;  %v404_v32 = vpack.c.bf16 %v232_v22, %v232_v22  ;;  %v203_v33 = vadd.f32 %v361_v14, %v202_v29  ;;  %v235_v34 = vadd.f32 %v361_v14, %v234_v30 }
 0x119   :  { %329 = vst.msk [vmem:[#allocation8 + $0x8] sm:$0xf] %vm326_vm3, %v398_v25  ;;  %337 = vst.msk [vmem:[#allocation8 + $0x28] sm:$0xf] %vm326_vm3, %v406_v26  ;;  %v399_v35 = vpack.c.bf16 %v211_v27, %v211_v27  ;;  %v407_v36 = vpack.c.bf16 %v243_v28, %v243_v28 }
 0x11a   :  { %327 = vst.msk [vmem:[#allocation8] sm:$0xf] %vm326_vm3, %v396_v31  ;;  %335 = vst.msk [vmem:[#allocation8 + $0x20] sm:$0xf] %vm326_vm3, %v404_v32  ;;  %v397_v37 = vpack.c.bf16 %v203_v33, %v203_v33  ;;  %v405_v38 = vpack.c.bf16 %v235_v34, %v235_v34 }
 0x11b   :  { %330 = vst.msk [vmem:[#allocation8 + $0xc] sm:$0xf] %vm326_vm3, %v399_v35  ;;  %338 = vst.msk [vmem:[#allocation8 + $0x2c] sm:$0xf] %vm326_vm3, %v407_v36 }
 0x11c   :  { %328 = vst.msk [vmem:[#allocation8 + $0x4] sm:$0xf] %vm326_vm3, %v397_v37  ;;  %336 = vst.msk [vmem:[#allocation8 + $0x24] sm:$0xf] %vm326_vm3, %v405_v38  ;;  %v432_v39 = vpop.f32.mrb[4].mxu0  ;;  %v440_v40 = vpop.f32.mrb[4].mxu1 }
 0x11d   :  { %v224_v41 = vadd.f32 %v432_v39, %v361_v14  ;;  %v256_v42 = vadd.f32 %v440_v40, %v361_v14  ;;  %v215_v43 = vpop.f32.mrb[5].mxu0  ;;  %v247_v44 = vpop.f32.mrb[5].mxu1 }
 0x11e   :  { %v216_v45 = vadd.f32 %v361_v14, %v215_v43  ;;  %v248_v46 = vadd.f32 %v361_v14, %v247_v44  ;;  %v433_v47 = vpop.f32.mrb[6].mxu0  ;;  %v441_v48 = vpop.f32.mrb[6].mxu1 }
 0x11f   :  { %v402_v49 = vpack.c.bf16 %v224_v41, %v224_v41  ;;  %v410_v50 = vpack.c.bf16 %v256_v42, %v256_v42  ;;  %v227_v51 = vadd.f32 %v433_v47, %v361_v14  ;;  %v259_v52 = vadd.f32 %v441_v48, %v361_v14  ;;  %v218_v53 = vpop.f32.mrb[7].mxu0  ;;  %v250_v54 = vpop.f32.mrb[7].mxu1 }
 0x120   :  { %v400_v55 = vpack.c.bf16 %v216_v45, %v216_v45  ;;  %v408_v56 = vpack.c.bf16 %v248_v46, %v248_v46  ;;  %v219_v57 = vadd.f32 %v361_v14, %v218_v53  ;;  %v251_v58 = vadd.f32 %v361_v14, %v250_v54 }
 0x121   :  { %333 = vst.msk [vmem:[#allocation8 + $0x18] sm:$0xf] %vm326_vm3, %v402_v49  ;;  %341 = vst.msk [vmem:[#allocation8 + $0x38] sm:$0xf] %vm326_vm3, %v410_v50  ;;  %v403_v59 = vpack.c.bf16 %v227_v51, %v227_v51  ;;  %v411_v60 = vpack.c.bf16 %v259_v52, %v259_v52 }
 0x122   :  { %331 = vst.msk [vmem:[#allocation8 + $0x10] sm:$0xf] %vm326_vm3, %v400_v55  ;;  %339 = vst.msk [vmem:[#allocation8 + $0x30] sm:$0xf] %vm326_vm3, %v408_v56  ;;  %v401_v61 = vpack.c.bf16 %v219_v57, %v219_v57  ;;  %v409_v62 = vpack.c.bf16 %v251_v58, %v251_v58 }
 0x123   :  { %334 = vst.msk [vmem:[#allocation8 + $0x1c] sm:$0xf] %vm326_vm3, %v403_v59  ;;  %342 = vst.msk [vmem:[#allocation8 + $0x3c] sm:$0xf] %vm326_vm3, %v411_v60 }
 0x124   :  { %332 = vst.msk [vmem:[#allocation8 + $0x14] sm:$0xf] %vm326_vm3, %v401_v61  ;;  %340 = vst.msk [vmem:[#allocation8 + $0x34] sm:$0xf] %vm326_vm3, %v409_v62 }
 0x125   :  { %540 = shalt.err (!%p537_p0)
}
 0x126   :  { %s541_s28 = scalar_lea.hbm %s675_s3, 1024 }
 0x127   :  { %p542_p1 = scmp.ne.s32.totalorder %s675_s3, %s541_s28  ;;  %p545_p2 = scmp.lt.u32.totalorder %s541_s28, %s675_s3 }
 0x129   :  { %p547_p3 = pnand %p545_p2, %p542_p1 }
 0x12b   :  { %550 = shalt.err (!%p547_p3)
}
 0x12c   :  { %354 = dma.vmem_to_hbm [thread:$0]  %s349_s22, 1024, %s675_s3, [#allocation4], %s559_s24, %s559_s24, %s560_s25  }
 0x12d   :  { %555 = dma.done.wait [#allocation4], 1024  }
 0x12e   :  { %556 = vsyncadd [#allocation4], 4294966272 }
 0x12f   :  { %358 = vsyncpa [#allocation3], 1 }
 0x130   :  { %359 = vsyncpa [#allocation6], 1 }
 0x131   :  { %360 = vsyncpa [#allocation4], 1 }

</bundles_post_ra>
